<compile_context>
chip_gen: v5e
topology: v5e:2x2
jax: 0.10.0
libtpu: 0.0.40
codegen_flags: <defaults>
</compile_context>

<pallas_src>
import math
import functools

import jax
import jax.numpy as jnp
from jax.experimental import pallas as pl
from jax.experimental.pallas import tpu as pltpu


def _round_up(x, m):
    return ((x + m - 1) // m) * m


def _qkv_proj_kernel(x_ref, wq_ref, bq_ref, wk_ref, wv_ref, bv_ref,
                     q_ref, k_ref, v_ref):
    """Project one (1, tp, H) bf16 x tile into fused-head bf16 Q (pre-scaled), K, V tiles."""
    x = x_ref[0]                                                     # (tp, H) bf16
    dn = (((1,), (0,)), ((), ()))
    q = jax.lax.dot_general(x, wq_ref[...], dn,
                            preferred_element_type=jnp.float32) + bq_ref[...]
    k = jax.lax.dot_general(x, wk_ref[...], dn,
                            preferred_element_type=jnp.float32)      # key: no bias
    v = jax.lax.dot_general(x, wv_ref[...], dn,
                            preferred_element_type=jnp.float32) + bv_ref[...]
    q_ref[0] = q.astype(jnp.bfloat16)
    k_ref[0] = k.astype(jnp.bfloat16)
    v_ref[0] = v.astype(jnp.bfloat16)


def _flash_attn_kernel(*refs, head_size, has_mask):
    """Both GlobalGraph heads for one (batch, q-tile, kv-tile) grid step.

    q_ref    : (1, tq, 2*Dh) bf16   pre-scaled queries (resident across the kv axis)
    k_ref    : (1, tk, 2*Dh) bf16   projected keys for this kv tile
    v_ref    : (1, tk, 2*Dh) bf16   projected values (bias included) for this kv tile
    mask_ref : (1, tq, tk) bf16     optional; 1 = attend, 0 = masked
    o_ref    : (1, tq, 2*Dh)        fused context output (head0 | head1 along lanes)
    scratch  : m_sc/l_sc (2,tq,1) f32, acc_sc (tq,2*Dh) f32 (heads adjacent along lanes)
    """
    if has_mask:
        q_ref, k_ref, v_ref, mask_ref, o_ref, m_sc, l_sc, acc_sc = refs
    else:
        q_ref, k_ref, v_ref, o_ref, m_sc, l_sc, acc_sc = refs

    ki = pl.program_id(2)
    nk = pl.num_programs(2)
    Dh = head_size

    @pl.when(ki == 0)
    def _():
        m_sc[...] = jnp.full_like(m_sc, -jnp.inf)
        l_sc[...] = jnp.zeros_like(l_sc)
        acc_sc[...] = jnp.zeros_like(acc_sc)

    q = q_ref[0]                                                     # (tq, 2*Dh) bf16
    k = k_ref[0]                                                     # (tk, 2*Dh) bf16
    v = v_ref[0]                                                     # (tk, 2*Dh) bf16

    if has_mask:
        # extended attention mask: 1 -> 0, 0 -> -10000.0 (matches PyTorch reference)
        mask_bias = (1.0 - mask_ref[0].astype(jnp.float32)) * (-10000.0)   # (tq, tk)

    for h in range(2):                                               # two half-width heads
        sl = slice(h * Dh, (h + 1) * Dh)
        # scores (1/sqrt(Dh) already folded into Q); contract last dims, no transpose.
        s = jax.lax.dot_general(q[:, sl], k[:, sl], (((1,), (1,)), ((), ())),
                                preferred_element_type=jnp.float32)  # (tq, tk)
        if has_mask:
            s = s + mask_bias

        # online softmax update for this head
        m_prev = m_sc[h]                                             # (tq, 1)
        m_new = jnp.maximum(m_prev, jnp.max(s, axis=-1, keepdims=True))
        alpha = jnp.exp(m_prev - m_new)
        p = jnp.exp(s - m_new)
        l_sc[h] = alpha * l_sc[h] + jnp.sum(p, axis=-1, keepdims=True)
        acc_sc[:, sl] = alpha * acc_sc[:, sl] + jax.lax.dot_general(
            p.astype(jnp.bfloat16), v[:, sl], (((1,), (0,)), ((), ())),
            preferred_element_type=jnp.float32)
        m_sc[h] = m_new

    # Finalize: normalize each head half in place, one lane-dense (tq, 2*Dh) store.
    @pl.when(ki == nk - 1)
    def _():
        acc_sc[:, 0:Dh] = acc_sc[:, 0:Dh] * pl.reciprocal(l_sc[0], approx=True)
        acc_sc[:, Dh:2 * Dh] = acc_sc[:, Dh:2 * Dh] * pl.reciprocal(l_sc[1], approx=True)
        o_ref[0] = acc_sc[...].astype(o_ref.dtype)


def global_graph_res(x, params, mask=None):
    """GlobalGraphRes.forward: concat of two half-width GlobalGraph self-attentions."""
    B, S, H = x.shape
    Dh = H // 2
    out_dtype = x.dtype

    (wq1, bq1, wk1, wv1, bv1), (wq2, bq2, wk2, wv2, bv2) = params
    scale = 1.0 / math.sqrt(Dh)

    # Pre-transpose PyTorch (out, in) Linear weights to (H, Dh), fuse both heads along
    # lanes, fold 1/sqrt(Dh) into the query weight/bias, cast MXU operands to bf16 once.
    wq = (jnp.concatenate([wq1.T, wq2.T], axis=1) * scale).astype(jnp.bfloat16)  # (H, 2*Dh)
    wk = jnp.concatenate([wk1.T, wk2.T], axis=1).astype(jnp.bfloat16)            # (H, 2*Dh)
    wv = jnp.concatenate([wv1.T, wv2.T], axis=1).astype(jnp.bfloat16)            # (H, 2*Dh)
    bq = (jnp.concatenate([bq1, bq2]) * scale).reshape(1, 2 * Dh).astype(jnp.float32)
    bv = jnp.concatenate([bv1, bv2]).reshape(1, 2 * Dh).astype(jnp.float32)

    # ---- tiling / padding --------------------------------------------------------------
    if S % 128 == 0:
        Sp = S
        tq = 128
        tk = 256 if S % 256 == 0 else 128        # wider kv tile fills v6e/v7x 256-wide MXU
    elif S < 128:
        Sp, tq, tk = S, S, S                      # single small tile, no padding needed
    else:
        Sp = _round_up(S, 128)                    # pad instead of one giant spilling tile
        tq, tk = 128, 128
    need_pad = Sp != S

    x_bf16 = x.astype(jnp.bfloat16)               # halves HBM->VMEM DMA; MXU is bf16 anyway
    if need_pad:
        x_bf16 = jnp.pad(x_bf16, ((0, 0), (0, Sp - S), (0, 0)))

    has_mask = (mask is not None) or need_pad
    if has_mask:
        if mask is None:
            # padding-only mask: padded keys must not be attended
            key_valid = (jnp.arange(Sp) < S).astype(jnp.bfloat16)
            mask_p = jnp.broadcast_to(key_valid[None, None, :], (B, Sp, Sp))
        else:
            mask_p = mask.astype(jnp.bfloat16)    # keeps (1-mask)*-10000 semantics
            if need_pad:
                mask_p = jnp.pad(mask_p, ((0, 0), (0, Sp - S), (0, Sp - S)))

    # ---- kernel 1: fused QKV projection (once per row, not once per kv step) ------------
    q, k, v = pl.pallas_call(
        _qkv_proj_kernel,
        out_shape=(jax.ShapeDtypeStruct((B, Sp, 2 * Dh), jnp.bfloat16),
                   jax.ShapeDtypeStruct((B, Sp, 2 * Dh), jnp.bfloat16),
                   jax.ShapeDtypeStruct((B, Sp, 2 * Dh), jnp.bfloat16)),
        grid_spec=pltpu.PrefetchScalarGridSpec(
            num_scalar_prefetch=0,
            grid=(B, Sp // tq),
            in_specs=[
                pl.BlockSpec((1, tq, H), lambda b, i: (b, i, 0)),      # x rows (bf16)
                pl.BlockSpec((H, 2 * Dh), lambda b, i: (0, 0)),        # Wq (fused, pre-T, scaled)
                pl.BlockSpec((1, 2 * Dh), lambda b, i: (0, 0)),        # bq (scaled)
                pl.BlockSpec((H, 2 * Dh), lambda b, i: (0, 0)),        # Wk (no bias)
                pl.BlockSpec((H, 2 * Dh), lambda b, i: (0, 0)),        # Wv
                pl.BlockSpec((1, 2 * Dh), lambda b, i: (0, 0)),        # bv
            ],
            out_specs=(
                pl.BlockSpec((1, tq, 2 * Dh), lambda b, i: (b, i, 0)),
                pl.BlockSpec((1, tq, 2 * Dh), lambda b, i: (b, i, 0)),
                pl.BlockSpec((1, tq, 2 * Dh), lambda b, i: (b, i, 0)),
            ),
        ),
        compiler_params=pltpu.CompilerParams(
            dimension_semantics=("parallel", "parallel")),
    )(x_bf16, wq, bq, wk, wv, bv)

    # ---- kernel 2: flash-style attention over pre-projected Q/K/V -----------------------
    kernel = functools.partial(_flash_attn_kernel, head_size=Dh, has_mask=has_mask)
    in_specs = [
        pl.BlockSpec((1, tq, 2 * Dh), lambda b, qi, ki: (b, qi, 0)),   # Q (resident per q-tile)
        pl.BlockSpec((1, tk, 2 * Dh), lambda b, qi, ki: (b, ki, 0)),   # K tile
        pl.BlockSpec((1, tk, 2 * Dh), lambda b, qi, ki: (b, ki, 0)),   # V tile
    ]
    inputs = [q, k, v]
    if has_mask:
        in_specs.append(pl.BlockSpec((1, tq, tk), lambda b, qi, ki: (b, qi, ki)))
        inputs.append(mask_p)

    out = pl.pallas_call(
        kernel,
        out_shape=jax.ShapeDtypeStruct((B, Sp, 2 * Dh), out_dtype),
        grid_spec=pltpu.PrefetchScalarGridSpec(
            num_scalar_prefetch=0,
            grid=(B, Sp // tq, Sp // tk),
            in_specs=in_specs,
            out_specs=pl.BlockSpec((1, tq, 2 * Dh), lambda b, qi, ki: (b, qi, 0)),
            scratch_shapes=[
                pltpu.VMEM((2, tq, 1), jnp.float32),        # running max per head
                pltpu.VMEM((2, tq, 1), jnp.float32),        # running denom per head
                pltpu.VMEM((tq, 2 * Dh), jnp.float32),      # running context, lane-dense
            ],
        ),
        compiler_params=pltpu.CompilerParams(
            dimension_semantics=("parallel", "parallel", "arbitrary")),
    )(*inputs)

    if need_pad:
        out = out[:, :S, :]
    return out


def _ref_attention(x, wq, bq, wk, wv, bv, mask):
    """Pure-JAX f32 reference matching the PyTorch GlobalGraph forward."""
    Dh = wq.shape[0]
    q = jnp.einsum('bsh,dh->bsd', x, wq) + bq
    k = jnp.einsum('bsh,dh->bsd', x, wk)
    v = jnp.einsum('bsh,dh->bsd', x, wv) + bv
    scores = jnp.einsum('bqd,bkd->bqk', q / math.sqrt(Dh), k)
    if mask is not None:
        scores = scores + (1.0 - mask) * (-10000.0)
    probs = jax.nn.softmax(scores, axis=-1)
    return jnp.einsum('bqk,bkd->bqd', probs, v)


def _make_params(key, hidden_size):
    """Deterministic synthetic parameters mimicking GlobalGraphRes.__init__ shapes."""
    Dh = hidden_size // 2
    keys = jax.random.split(key, 10)

    def lin_w(k):
        return (jax.random.normal(k, (Dh, hidden_size), jnp.float32)
                / math.sqrt(hidden_size))

    def lin_b(k):
        return jax.random.normal(k, (Dh,), jnp.float32) * 0.01

    p1 = (lin_w(keys[0]), lin_b(keys[1]), lin_w(keys[2]),
          lin_w(keys[3]), lin_b(keys[4]))
    p2 = (lin_w(keys[5]), lin_b(keys[6]), lin_w(keys[7]),
          lin_w(keys[8]), lin_b(keys[9]))
    return p1, p2


# TODO(synk): the `mapping`/visualize attention-score capture and return_scores branches of
# GlobalGraph are debug-only and not part of GlobalGraphRes.forward; they are not implemented.

if __name__ == "__main__":
    B, S, H = 2, 8, 32          # batch, sequence, hidden_size
    key = jax.random.PRNGKey(0)
    kx, km, kp = jax.random.split(key, 3)

    x = jax.random.normal(kx, (B, S, H), jnp.float32)
    # binary attention mask (1 = attend, 0 = masked), make sure at least the diagonal attends
    mask = (jax.random.uniform(km, (B, S, S)) > 0.3).astype(jnp.float32)
    mask = jnp.maximum(mask, jnp.eye(S, dtype=jnp.float32)[None, :, :])

    params = _make_params(kp, H)

    # masked path
    out = global_graph_res(x, params, mask)
    out = jax.block_until_ready(out)
    ref = jnp.concatenate([_ref_attention(x, *params[0], mask),
                           _ref_attention(x, *params[1], mask)], axis=-1)
    assert out.shape == (B, S, H)
    assert jnp.allclose(out, ref, atol=5e-2, rtol=5e-2)

    # no-mask fast path
    out_nm = jax.block_until_ready(global_graph_res(x, params, None))
    ref_nm = jnp.concatenate([_ref_attention(x, *params[0], None),
                              _ref_attention(x, *params[1], None)], axis=-1)
    assert out_nm.shape == (B, S, H)
    assert jnp.allclose(out_nm, ref_nm, atol=5e-2, rtol=5e-2)

    print("KERNEL_OK")
</pallas_src>

<mosaic_0001>
module attributes {stable_mosaic.version = 11 : i64} {
  func.func @_qkv_proj_kernel(%arg0: i32, %arg1: i32, %arg2: memref<1x8x32xbf16, #tpu.memory_space<vmem>>, %arg3: memref<32x32xbf16, #tpu.memory_space<vmem>>, %arg4: memref<1x32xf32, #tpu.memory_space<vmem>>, %arg5: memref<32x32xbf16, #tpu.memory_space<vmem>>, %arg6: memref<32x32xbf16, #tpu.memory_space<vmem>>, %arg7: memref<1x32xf32, #tpu.memory_space<vmem>>, %arg8: memref<1x8x32xbf16, #tpu.memory_space<vmem>>, %arg9: memref<1x8x32xbf16, #tpu.memory_space<vmem>>, %arg10: memref<1x8x32xbf16, #tpu.memory_space<vmem>>) attributes {dimension_semantics = [#tpu.dimension_semantics<parallel>, #tpu.dimension_semantics<parallel>], iteration_bounds = array<i64: 2, 1>, scalar_prefetch = 0 : i64, scratch_operands = 0 : i64, tpu.core_type = #tpu.core_type<tc>, window_params = [{transform_indices = @transform_0, window_bounds = array<i64: 1, 8, 32>}, {pipeline_mode = #tpu.pipeline_mode<synchronous>, transform_indices = @transform_1, window_bounds = array<i64: 32, 32>}, {pipeline_mode = #tpu.pipeline_mode<synchronous>, transform_indices = @transform_2, window_bounds = array<i64: 1, 32>}, {pipeline_mode = #tpu.pipeline_mode<synchronous>, transform_indices = @transform_3, window_bounds = array<i64: 32, 32>}, {pipeline_mode = #tpu.pipeline_mode<synchronous>, transform_indices = @transform_4, window_bounds = array<i64: 32, 32>}, {pipeline_mode = #tpu.pipeline_mode<synchronous>, transform_indices = @transform_5, window_bounds = array<i64: 1, 32>}, {transform_indices = @transform_6, window_bounds = array<i64: 1, 8, 32>}, {transform_indices = @transform_7, window_bounds = array<i64: 1, 8, 32>}, {transform_indices = @transform_8, window_bounds = array<i64: 1, 8, 32>}]} {
    %c0 = arith.constant 0 : index
    %c0_0 = arith.constant 0 : index
    %c0_1 = arith.constant 0 : index
    %0 = vector.load %arg2[%c0, %c0_0, %c0_1] : memref<1x8x32xbf16, #tpu.memory_space<vmem>>, vector<1x8x32xbf16>
    %1 = vector.shape_cast %0 : vector<1x8x32xbf16> to vector<8x32xbf16>
    %c0_2 = arith.constant 0 : index
    %c0_3 = arith.constant 0 : index
    %2 = vector.load %arg3[%c0_2, %c0_3] : memref<32x32xbf16, #tpu.memory_space<vmem>>, vector<32x32xbf16>
    %cst = arith.constant dense<0.000000e+00> : vector<8x32xf32>
    %3 = tpu.matmul %1, %2, %cst {dimension_numbers = #tpu.dot_dimension_numbers<[1], [0], [0], [1], [0, 0, 1, 1], [], []>} : vector<8x32xbf16>, vector<32x32xbf16>, vector<8x32xf32> -> vector<8x32xf32>
    %c0_4 = arith.constant 0 : index
    %c0_5 = arith.constant 0 : index
    %4 = vector.load %arg4[%c0_4, %c0_5] : memref<1x32xf32, #tpu.memory_space<vmem>>, vector<1x32xf32>
    %5 = vector.broadcast %4 : vector<1x32xf32> to vector<8x32xf32>
    %6 = arith.addf %3, %5 : vector<8x32xf32>
    %c0_6 = arith.constant 0 : index
    %c0_7 = arith.constant 0 : index
    %7 = vector.load %arg5[%c0_6, %c0_7] : memref<32x32xbf16, #tpu.memory_space<vmem>>, vector<32x32xbf16>
    %cst_8 = arith.constant dense<0.000000e+00> : vector<8x32xf32>
    %8 = tpu.matmul %1, %7, %cst_8 {dimension_numbers = #tpu.dot_dimension_numbers<[1], [0], [0], [1], [0, 0, 1, 1], [], []>} : vector<8x32xbf16>, vector<32x32xbf16>, vector<8x32xf32> -> vector<8x32xf32>
    %c0_9 = arith.constant 0 : index
    %c0_10 = arith.constant 0 : index
    %9 = vector.load %arg6[%c0_9, %c0_10] : memref<32x32xbf16, #tpu.memory_space<vmem>>, vector<32x32xbf16>
    %cst_11 = arith.constant dense<0.000000e+00> : vector<8x32xf32>
    %10 = tpu.matmul %1, %9, %cst_11 {dimension_numbers = #tpu.dot_dimension_numbers<[1], [0], [0], [1], [0, 0, 1, 1], [], []>} : vector<8x32xbf16>, vector<32x32xbf16>, vector<8x32xf32> -> vector<8x32xf32>
    %c0_12 = arith.constant 0 : index
    %c0_13 = arith.constant 0 : index
    %11 = vector.load %arg7[%c0_12, %c0_13] : memref<1x32xf32, #tpu.memory_space<vmem>>, vector<1x32xf32>
    %12 = vector.broadcast %11 : vector<1x32xf32> to vector<8x32xf32>
    %13 = arith.addf %10, %12 : vector<8x32xf32>
    %14 = arith.truncf %6 : vector<8x32xf32> to vector<8x32xbf16>
    %c0_14 = arith.constant 0 : index
    %c0_15 = arith.constant 0 : index
    %c0_16 = arith.constant 0 : index
    %15 = vector.load %arg8[%c0_14, %c0_15, %c0_16] : memref<1x8x32xbf16, #tpu.memory_space<vmem>>, vector<1x8x32xbf16>
    %16 = vector.shape_cast %15 : vector<1x8x32xbf16> to vector<8x32xbf16>
    %17 = vector.shape_cast %14 : vector<8x32xbf16> to vector<1x8x32xbf16>
    tpu.vector_store %arg8[%c0_14, %c0_15, %c0_16], %17 {strides = array<i32>} : memref<1x8x32xbf16, #tpu.memory_space<vmem>>, vector<1x8x32xbf16>,
    %18 = arith.truncf %8 : vector<8x32xf32> to vector<8x32xbf16>
    %c0_17 = arith.constant 0 : index
    %c0_18 = arith.constant 0 : index
    %c0_19 = arith.constant 0 : index
    %19 = vector.load %arg9[%c0_17, %c0_18, %c0_19] : memref<1x8x32xbf16, #tpu.memory_space<vmem>>, vector<1x8x32xbf16>
    %20 = vector.shape_cast %19 : vector<1x8x32xbf16> to vector<8x32xbf16>
    %21 = vector.shape_cast %18 : vector<8x32xbf16> to vector<1x8x32xbf16>
    tpu.vector_store %arg9[%c0_17, %c0_18, %c0_19], %21 {strides = array<i32>} : memref<1x8x32xbf16, #tpu.memory_space<vmem>>, vector<1x8x32xbf16>,
    %22 = arith.truncf %13 : vector<8x32xf32> to vector<8x32xbf16>
    %c0_20 = arith.constant 0 : index
    %c0_21 = arith.constant 0 : index
    %c0_22 = arith.constant 0 : index
    %23 = vector.load %arg10[%c0_20, %c0_21, %c0_22] : memref<1x8x32xbf16, #tpu.memory_space<vmem>>, vector<1x8x32xbf16>
    %24 = vector.shape_cast %23 : vector<1x8x32xbf16> to vector<8x32xbf16>
    %25 = vector.shape_cast %22 : vector<8x32xbf16> to vector<1x8x32xbf16>
    tpu.vector_store %arg10[%c0_20, %c0_21, %c0_22], %25 {strides = array<i32>} : memref<1x8x32xbf16, #tpu.memory_space<vmem>>, vector<1x8x32xbf16>,
    return
  }
  func.func @transform_0(%arg0: i32, %arg1: i32) -> (i32, i32, i32) {
    %c0_i32 = arith.constant 0 : i32
    %c0_i32_0 = arith.constant 0 : i32
    return %arg0, %arg1, %c0_i32 : i32, i32, i32
  }
  func.func @transform_1(%arg0: i32, %arg1: i32) -> (i32, i32) {
    %c0_i32 = arith.constant 0 : i32
    %c0_i32_0 = arith.constant 0 : i32
    %c0_i32_1 = arith.constant 0 : i32
    return %c0_i32, %c0_i32_0 : i32, i32
  }
  func.func @transform_2(%arg0: i32, %arg1: i32) -> (i32, i32) {
    %c0_i32 = arith.constant 0 : i32
    %c0_i32_0 = arith.constant 0 : i32
    %c0_i32_1 = arith.constant 0 : i32
    return %c0_i32, %c0_i32_0 : i32, i32
  }
  func.func @transform_3(%arg0: i32, %arg1: i32) -> (i32, i32) {
    %c0_i32 = arith.constant 0 : i32
    %c0_i32_0 = arith.constant 0 : i32
    %c0_i32_1 = arith.constant 0 : i32
    return %c0_i32, %c0_i32_0 : i32, i32
  }
  func.func @transform_4(%arg0: i32, %arg1: i32) -> (i32, i32) {
    %c0_i32 = arith.constant 0 : i32
    %c0_i32_0 = arith.constant 0 : i32
    %c0_i32_1 = arith.constant 0 : i32
    return %c0_i32, %c0_i32_0 : i32, i32
  }
  func.func @transform_5(%arg0: i32, %arg1: i32) -> (i32, i32) {
    %c0_i32 = arith.constant 0 : i32
    %c0_i32_0 = arith.constant 0 : i32
    %c0_i32_1 = arith.constant 0 : i32
    return %c0_i32, %c0_i32_0 : i32, i32
  }
  func.func @transform_6(%arg0: i32, %arg1: i32) -> (i32, i32, i32) {
    %c0_i32 = arith.constant 0 : i32
    %c0_i32_0 = arith.constant 0 : i32
    return %arg0, %arg1, %c0_i32 : i32, i32, i32
  }
  func.func @transform_7(%arg0: i32, %arg1: i32) -> (i32, i32, i32) {
    %c0_i32 = arith.constant 0 : i32
    %c0_i32_0 = arith.constant 0 : i32
    return %arg0, %arg1, %c0_i32 : i32, i32, i32
  }
  func.func @transform_8(%arg0: i32, %arg1: i32) -> (i32, i32, i32) {
    %c0_i32 = arith.constant 0 : i32
    %c0_i32_0 = arith.constant 0 : i32
    return %arg0, %arg1, %c0_i32 : i32, i32, i32
  }
}

</mosaic_0001>

<bundles_post_ra>
// kernel: tpu_custom_call.1
= control target key start
LH: loop header
LB: loop body
LE: loop exit
PB: predicated region body
PF: predicated region fallthrough
CT: control target
= control target key end

     0   :  { %s1483_s0 = inlined_call_operand.hbm [shape: bf16[2,8,32], index: 0, kind: input, shape index: {}]   ;;  %s1484_s1 = inlined_call_operand.hbm [shape: bf16[32,32], index: 1, kind: input, shape index: {}]   ;;  %s1485_s2 = inlined_call_operand.vmem [shape: f32[1,32], index: 2, kind: input, shape index: {}]   ;;  %s1486_s3 = inlined_call_operand.hbm [shape: bf16[32,32], index: 3, kind: input, shape index: {}]   ;;  %s1487_s4 = inlined_call_operand.hbm [shape: bf16[32,32], index: 4, kind: input, shape index: {}]   ;;  %s1488_s5 = inlined_call_operand.vmem [shape: f32[1,32], index: 5, kind: input, shape index: {}]   ;;  %s1489_s6 = inlined_call_operand.hbm [shape: bf16[2,8,32], index: 6, kind: output, shape index: {0}]   ;;  %s1490_s7 = inlined_call_operand.hbm [shape: bf16[2,8,32], index: 7, kind: output, shape index: {1}]   ;;  %s1491_s8 = inlined_call_operand.hbm [shape: bf16[2,8,32], index: 8, kind: output, shape index: {2}]  }
   0x1   :  { %1497 = sst [smem:[#allocation21_spill]] %s1483_s0 }
   0x2   :  { %1498 = sst [smem:[#allocation22_spill]] %s1484_s1 }
   0x3   :  { %1499 = sst [smem:[#allocation23_spill]] %s1485_s2 }
   0x4   :  { %1500 = sst [smem:[#allocation24_spill]] %s1486_s3 }
   0x5   :  { %1501 = sst [smem:[#allocation25_spill]] %s1487_s4 }
   0x6   :  { %14 = vsyncpa [#allocation3], 0 }
   0x7   :  { %16 = vsyncpa [#allocation3 + $0x1], 0 }
   0x8   :  { %17 = vsyncpa [#allocation6], 0 }
   0x9   :  { %18 = vsyncpa [#allocation9], 0 }
   0xa   :  { %19 = vsyncpa [#allocation4], 0 }
   0xb   :  { %21 = vsyncpa [#allocation4 + $0x1], 0 }
   0xc   :  { %22 = vsyncpa [#allocation12], 0 }
   0xd   :  { %24 = vsyncpa [#allocation12 + $0x1], 0  ;;  %s1238_s27 = smov 0   ;;  %s1240_s28 = smov 0  }
   0xe   :  { %s1242_s29 = smov 0   ;;  %s1244_s30 = smov 0  }
   0xf   :  { %s1246_s9 = smov 0   ;;  %s1248_s10 = smov 0  }
  0x10 LB: > { %s1269_s11 = sadd.s32 4294967295, %s1186_s10   ;;  %p753_p0 = scmp.ge.s32.totalorder %s1186_s10, 1  ;;  %s1186_s10 = sphi %s1248_s10, %s30_s10   ;;  %s1182_s9 = sphi %s1246_s9, %s1526_s9   ;;  %s1178_s30 = sphi %s1244_s30, %s1525_s30   ;;  %s1174_s29 = sphi %s1242_s29, %s1524_s29   ;;  %s1170_s28 = sphi %s1240_s28, %s1523_s28   ;;  %s1166_s27 = sphi %s1238_s27, %s1522_s27  }
  0x11   : > { %p65_p1 = scmp.eq.s32.totalorder %s1269_s11, 0  ;;  %p264_p2 = scmp.lt.s32.totalorder %s1186_s10, 3 }
  0x12   : > { %s1502_s1 = sld [smem:[#allocation22_spill]]  ;;  %s1188_s16 = smov [#allocation5]  }
  0x13   : > { %p1277_p3 = pnand %p753_p0, %p264_p2  ;;  %s277_s17 = sshll.u32 %s1188_s16, 4  ;;  %s278_s17 = int_to_ptr.vmem [resolvable:$true] %s277_s17 }
  0x14   : > { %p757_p6 = scmp.ge.s32.totalorder %s1186_s10, 2  ;;  %s1505_s3 = sld [smem:[#allocation24_spill]] }
  0x15   : > { %p829_p4 = pneg %p1277_p3  ;;  %s1189_s22 = smov 64  }
  0x16   : > { %s1190_s23 = smov 4   ;;  %s1191_s24 = smov [#allocation7]  }
  0x17   : > { %p1285_p5 = pnand %p829_p4, %p65_p1  ;;  %s294_s25 = sshll.u32 %s1191_s24, 4  ;;  %s295_s25 = int_to_ptr.vmem [resolvable:$true] %s294_s25 }
  0x18   : > { %s275_s14 = sshll.u32 %s1502_s1, 4  ;;  %s1506_s4 = sld [smem:[#allocation25_spill]]  ;;  %s276_s14 = int_to_ptr.hbm [resolvable:$true] %s275_s14 }
  0x19   : > { %832 = dma.hbm_to_vmem [thread:$0]  (!%p1285_p5), %s276_s14, 256, %s278_s17, [#allocation6], %s1189_s22, %s1189_s22, %s1190_s23  }
  0x1a   : > { %s292_s21 = sshll.u32 %s1505_s3, 4  ;;  %s1192_s16 = smov [#allocation8]   ;;  %s293_s21 = int_to_ptr.hbm [resolvable:$true] %s292_s21 }
  0x1b   : > { %835 = dma.hbm_to_vmem [thread:$0]  (!%p1285_p5), %s293_s21, 256, %s295_s25, [#allocation6], %s1189_s22, %s1189_s22, %s1190_s23  }
  0x1c   : > { %s308_s19 = sshll.u32 %s1192_s16, 4  ;;  %s1492_s14 = sadd.s32 4294967294, %s1186_s10   ;;  %s309_s19 = int_to_ptr.vmem [resolvable:$true] %s308_s19 }
  0x1d   : > { %s42_s17 = sadd.s32 1, %s1182_s9  ;;  %s51_s20 = sadd.s32 1, %s1174_s29 }
  0x1e   : > { %s306_s13 = sshll.u32 %s1506_s4, 4  ;;  %p44_p7 = scmp.ge.s32.totalorder %s42_s17, 2  ;;  %s307_s13 = int_to_ptr.hbm [resolvable:$true] %s306_s13 }
  0x1f   : > { %838 = dma.hbm_to_vmem [thread:$0]  (!%p1285_p5), %s307_s13, 256, %s309_s19, [#allocation9], %s1189_s22, %s1189_s22, %s1190_s23  }
  0x20   : > { %p58_p8 = scmp.ne.s32.totalorder %s1174_s29, %s1170_s28  ;;  %p59_p9 = scmp.eq.s32.totalorder %s1186_s10, 0 }
  0x21   : > { %p64_p10 = scmp.ne.s32.totalorder %s1170_s28, %s1166_s27  ;;  %s1528_s17 = smov (%p44_p7, %s42_s17), 0 }
  0x22   : > { %p1312_p11 = por %p59_p9, %p58_p8  ;;  %s46_s22 = ssub.s32 %s1182_s9, %s1528_s17 }
  0x23   : > { %p1318_p12 = por %p65_p1, %p64_p10  ;;  %p195_p13 = scmp.eq.s32.totalorder %s1269_s11, 1 }
  0x24   : > { %p49_p0 = scmp.eq.s32.totalorder %s46_s22, 0  ;;  %p201_p2 = scmp.eq.s32.totalorder %s1492_s14, 1 }
  0x25   : > { %p1327_p4 = por %p195_p13, %p58_p8  ;;  %p856_p5 = scmp.lt.s32.totalorder %s1186_s10, 2 }
  0x26   : > { %s1333_s24 = scalar_select %p49_p0, %s1174_s29, %s51_s20  }
  0x27   : > { %p1335_p7 = por %p201_p2, %p64_p10  ;;  %s325_s26 = sand.u32 1, %s1174_s29  }
  0x28   : > { %s758_s12 = sshll.u32 %s325_s26, 2  ;;  %s759_s13 = sshll.u32 %s1182_s9, 2 }
  0x29   : > { %s1511_s0 = sld [smem:[#allocation21_spill]]  ;;  %s329_s1 = scalar_lea.vmem [#allocation2], %s758_s12 }
  0x2a   : > { %s338_s14 = sshll.u32 %s329_s1, 4  ;;  %p840_p8 = pnand %p856_p5, %p1312_p11  ;;  %s339_s14 = int_to_ptr.vmem [resolvable:$true] %s338_s14 }
  0x2b   : > { %s326_s20 = scalar_lea.sflag [#allocation3], %s325_s26 }
  0x2d   : > { %347 = sbr.rel (%p1277_p3) target bundleno = 239 (0xef), region = 44 }
  0x2f   : > { %s334_s22 = scalar_lea.hbm %s1511_s0, %s759_s13 }
  0x30   : > { %s336_s3 = sshll.u32 %s334_s22, 4  ;;  %s337_s3 = int_to_ptr.hbm [resolvable:$true] %s336_s3 }
  0x31   : > { %842 = dma.hbm_to_vmem [thread:$0]  (!%p840_p8), %s337_s3, 64, %s339_s14, %s326_s20  }
  0x32   : > { %s1349_s4 = sand.u32 1, %s1170_s28  }
  0x33   : > { %s1352_s16 = sshll.u32 %s1349_s4, 2  ;;  %s350_s1 = scalar_lea.sflag [#allocation3], %s1349_s4 }
  0x34   : > { %s353_s12 = scalar_lea.vmem [#allocation2], %s1352_s16 }
  0x35   : > { %1145 = dma.done.wait (%p1318_p12), %s350_s1, 64  }
  0x36   : > { %1147 = vsyncadd (%p1318_p12), %s350_s1, 4294967232 }
  0x37   : > { %1149 = dma.done.wait (%p65_p1), [#allocation6], 512  }
  0x38   : > { %1151 = vsyncadd (%p65_p1), [#allocation6], 4294966784 }
  0x39   : > { %1153 = dma.done.wait (%p65_p1), [#allocation9], 256  }
  0x3a   : > { %1155 = vsyncadd (%p65_p1), [#allocation9], 4294967040  ;;  %v804_v0 = vld [vmem:[#allocation5 + $0x8] sm:$0xff]  ;;  %v806_v1 = vld [vmem:[#allocation7 + $0x8] sm:$0xff]  ;;  %vm434_vm0 = vcmask 261120   ;;  %s1369_s3 = sshll.u32 %s1178_s30, 2 }
  0x3b   : > { %v808_v2 = vld [vmem:[#allocation8 + $0x8] sm:$0xff]  ;;  %444 = vmatpush.bf16.msra.mxu0 %v804_v0  ;;  %473 = vmatpush.bf16.msra.mxu1 %v806_v1  ;;  %v803_v3 = vld [vmem:[#allocation5] sm:$0xff]  ;;  %v805_v4 = vld [vmem:[#allocation7] sm:$0xff]  ;;  %s557_s21 = scalar_lea.hbm %s1490_s7, %s1369_s3  ;;  %s542_s13 = scalar_lea.hbm %s1489_s6, %s1369_s3  ;;  %vm514_vm1 = vcmask 257024  }
  0x3c   : > { %506 = vmatpush.bf16.msra.mxu2 %v808_v2  ;;  %v807_v5 = vld [vmem:[#allocation8] sm:$0xff]  ;;  %v413_v6 = vld [vmem:[%s353_s12] sm:$0xf]  ;;  %s1512_s2 = sld [smem:[#allocation23_spill]]  ;;  %s525_s20 = sand.u32 1, %s1269_s11  }
  0x3d   : > { %s404_s1 = scalar_lea.vmem [#allocation11], %s1352_s16  ;;  %s1386_s30 = sshll.u32 %s557_s21, 4  ;;  %v915_v13 = vld [vmem:[%s1488_s5] ss:$0 sm:$0xff]  ;;  %s562_s30 = int_to_ptr.hbm [resolvable:$true] %s1386_s30 }
  0x3e   : > { %s1384_s12 = sshll.u32 %s404_s1, 4  ;;  %s1493_s15 = scalar_lea.vmem [#allocation10], %s1352_s16  ;;  %s560_s12 = int_to_ptr.vmem [resolvable:$true] %s1384_s12 }
  0x3f   : > { %445 = vmatpush.bf16.msra.mxu0 %v803_v3  ;;  %474 = vmatpush.bf16.msra.mxu1 %v805_v4  ;;  %s1391_s14 = sshll.u32 %s1493_s15, 4  ;;  %s1393_s18 = sshll.u32 %s542_s13, 4 }
  0x40   : > { %507 = vmatpush.bf16.msra.mxu2 %v807_v5  ;;  %1513 = sst [smem:[#allocation19_spill]] %s1391_s14  ;;  %s572_s26 = scalar_lea.hbm %s1491_s8, %s1369_s3 }
  0x41   : > { %1514 = sst [smem:[#allocation20_spill]] %s1393_s18  ;;  %s1407_s22 = scalar_lea.sflag [#allocation12], %s525_s20 }
  0x42   : > { %776 = vmatmul.msk.bf16.vlgmr.msra.gmra.mxu0 %vm434_vm0, %v413_v6  ;;  %785 = vmatmul.msk.bf16.vlgmr.msra.gmra.mxu1 %vm434_vm0, %v413_v6  ;;  %v914_v7 = vld [vmem:[%s1512_s2] ss:$0 sm:$0xff]  ;;  %s1050_s15 = sshra.s32 %s562_s30, 4  ;;  %s1051_s15 = int_to_ptr.hbm [resolvable:$true] %s1050_s15 }
  0x43   : > { %794 = vmatmul.msk.bf16.vlgmr.msra.gmra.mxu2 %vm434_vm0, %v413_v6  ;;  %s1052_s0 = scalar_lea.hbm %s1051_s15, 4  ;;  %p1057_p10 = scmp.lt.s32.totalorder %s1051_s15, %s1490_s7 }
  0x44   : > { %p1053_p1 = scmp.ne.s32.totalorder %s1051_s15, %s1052_s0 }
  0x46   : > { %p1054_p3 = pnand %p1053_p1, %p1327_p4 }
  0x48   : > { %p1055_p9 = pneg %p1054_p3 }
  0xbf   : > { %v447_v8 = vpop.f32.mrf.mxu0  ;;  %v476_v9 = vpop.f32.mrf.mxu1 }
  0xc0   : > { %v448_v10 = vadd.f32 %v914_v7, %v447_v8  ;;  %v516_v11 = vpack.c.bf16 %v476_v9, %v476_v9 }
  0xc2   : > { %v513_v12 = vpack.c.bf16 %v448_v10, %v448_v10  ;;  %517 = vst.msk [vmem:[%s404_s1] sm:$0xf] %vm514_vm1, %v516_v11  ;;  %s1056_s1 = scalar_lea.hbm %s1490_s7, 8 }
  0xc3   : > { %p1058_p11 = scmp.lt.s32.totalorder %s1056_s1, %s1052_s0 }
  0xc5   : > { %p1059_p12 = por %p1058_p11, %p1057_p10 }
  0xc7   : > { %p1060_p13 = pnand %p1059_p12, %p1055_p9 }
  0xc9   : > { %1063 = shalt.err (!%p1060_p13)
}
  0xca   : > { %s1515_s20 = sld [smem:[#allocation20_spill]]  ;;  %s1516_s21 = scalar_lea.vmem [#allocation10], %s1352_s16 }
  0xcb   : > { %824 = dma.vmem_to_hbm [thread:$0]  (%p1327_p4), %s560_s12, 64, %s562_s30, %s1407_s22   ;;  %515 = vst.msk [vmem:[%s1516_s21] sm:$0xf] %vm514_vm1, %v513_v12 }
  0xcc   : > { %s521_s14 = scalar_lea.sflag [#allocation4], %s1349_s4  ;;  %s1084_s19 = scalar_lea.hbm %s1489_s6, 8 }
  0xd0   : > { %s1517_s18 = int_to_ptr.hbm [resolvable:$true] %s1515_s20 }
  0xd1   : > { %s1078_s13 = sshra.s32 %s1517_s18, 4  ;;  %s1079_s13 = int_to_ptr.hbm [resolvable:$true] %s1078_s13 }
  0xd2   : > { %s1080_s2 = scalar_lea.hbm %s1079_s13, 4  ;;  %p1085_p8 = scmp.lt.s32.totalorder %s1079_s13, %s1489_s6 }
  0xd3   : > { %p1081_p0 = scmp.ne.s32.totalorder %s1079_s13, %s1080_s2  ;;  %p1086_p1 = scmp.lt.s32.totalorder %s1084_s19, %s1080_s2 }
  0xd5   : > { %p1082_p2 = pnand %p1081_p0, %p1327_p4  ;;  %p1087_p3 = por %p1086_p1, %p1085_p8 }
  0xd7   : > { %p1083_p5 = pneg %p1082_p2 }
  0xd9   : > { %p1088_p9 = pnand %p1087_p3, %p1083_p5 }
  0xdb   : > { %1091 = shalt.err (!%p1088_p9)
}
  0xdc   : > { %s1518_s4 = smov %s1517_s18  ;;  %s1519_s12 = sld [smem:[#allocation19_spill]]  ;;  %v509_v14 = vpop.f32.mrf.mxu2  ;;  %v449_v16 = vpop.f32.mrf.mxu0 }
  0xdd   : > { %s411_s21 = scalar_lea.vmem [#allocation13], %s1352_s16  ;;  %s576_s13 = sshll.u32 %s572_s26, 4  ;;  %v510_v15 = vadd.f32 %v915_v13, %v509_v14  ;;  %v478_v17 = vpop.f32.mrf.mxu1  ;;  %s577_s13 = int_to_ptr.hbm [resolvable:$true] %s576_s13 }
  0xde   : > { %s574_s18 = sshll.u32 %s411_s21, 4  ;;  %s1106_s20 = sshra.s32 %s577_s13, 4  ;;  %s575_s18 = int_to_ptr.vmem [resolvable:$true] %s574_s18  ;;  %s1107_s20 = int_to_ptr.hbm [resolvable:$true] %s1106_s20 }
  0xdf   : > { %v518_v18 = vpack.c.bf16 %v510_v15, %v510_v15  ;;  %s1112_s3 = scalar_lea.hbm %s1491_s8, 8  ;;  %p1113_p13 = scmp.lt.s32.totalorder %s1107_s20, %s1491_s8 }
  0xe1   : > { %519 = vst.msk [vmem:[%s411_s21] sm:$0xf] %vm514_vm1, %v518_v18 }
  0xe2   : > { %s1520_s30 = int_to_ptr.vmem [resolvable:$true] %s1519_s12 }
  0xe3   : > { %823 = dma.vmem_to_hbm [thread:$0]  (%p1327_p4), %s1520_s30, 64, %s1518_s4, %s521_s14  }
  0xe4   : > { %s1108_s14 = scalar_lea.hbm %s1107_s20, 4 }
  0xe5   : > { %p1109_p10 = scmp.ne.s32.totalorder %s1107_s20, %s1108_s14  ;;  %p1114_p0 = scmp.lt.s32.totalorder %s1112_s3, %s1108_s14 }
  0xe7   : > { %p1110_p11 = pnand %p1109_p10, %p1327_p4  ;;  %p1115_p2 = por %p1114_p0, %p1113_p13 }
  0xe9   : > { %p1111_p12 = pneg %p1110_p11 }
  0xeb   : > { %p1116_p5 = pnand %p1115_p2, %p1111_p12 }
  0xed   : > { %1119 = shalt.err (!%p1116_p5)
}
  0xee   : > { %825 = dma.vmem_to_hbm [thread:$0]  (%p1327_p4), %s575_s18, 64, %s577_s13, %s1407_s22   ;;  %v511_v19 = vpop.f32.mrf.mxu2 }
  0xef PF: > { %s588_s1 = sand.u32 1, %s1166_s27   ;;  %p844_p8 = pnand %p757_p6, %p1335_p7 }
  0xf0   : > { %s589_s11 = scalar_lea.sflag [#allocation4], %s588_s1 }
  0xf1   : > { %p845_p1 = pneg %p844_p8 }
  0xf3   : > { %1157 = dma.done.wait (%p845_p1), %s589_s11, 64  }
  0xf4   : > { %1159 = vsyncadd (%p845_p1), %s589_s11, 4294967232  ;;  %s1521_s4 = sadd.s32 4294967294, %s1186_s10  }
  0xf5   : > { %s598_s12 = sand.u32 1, %s1521_s4  }
  0xf6   : > { %s599_s30 = scalar_lea.sflag [#allocation12], %s598_s12 }
  0xf7   : > { %1161 = dma.done.wait (%p845_p1), %s599_s30, 128  }
  0xf8   : > { %1163 = vsyncadd (%p845_p1), %s599_s30, 4294967168  ;;  %s30_s10 = sadd.s32 1, %s1186_s10   ;;  %s1522_s27 = smov %s1170_s28 }
  0xf9   : > { %p27_p4 = scmp.ge.s32.totalorder %s30_s10, 4   ;;  %s1523_s28 = smov %s1174_s29 }
  0xfa   : > { %s1524_s29 = smov %s1333_s24  ;;  %s1525_s30 = smov %s1182_s9 }
  0xfb   : > { %s1526_s9 = smov %s1528_s17  ;;  %29 = sbr.rel (!%p27_p4) target bundleno = 16 (0x10), region = 133 }
 0x100   :  { %615 = vsyncpa [#allocation3], 1 }
 0x101   :  { %617 = vsyncpa [#allocation3 + $0x1], 1 }
 0x102   :  { %618 = vsyncpa [#allocation6], 1 }
 0x103   :  { %619 = vsyncpa [#allocation9], 1 }
 0x104   :  { %620 = vsyncpa [#allocation4], 1 }
 0x105   :  { %622 = vsyncpa [#allocation4 + $0x1], 1 }
 0x106   :  { %623 = vsyncpa [#allocation12], 1 }
 0x107   :  { %625 = vsyncpa [#allocation12 + $0x1], 1 }

</bundles_post_ra>
